<compile_context>
chip_gen: v6e
topology: v6e:2x2x1
jax: 0.10.0
libtpu: 0.0.40
codegen_flags: <defaults>
</compile_context>

<pallas_src>
import jax
import jax.numpy as jnp
import numpy as np
from jax.experimental import pallas as pl
from jax.experimental.pallas import tpu as pltpu

# ---- module "parameters" (deterministic, from __init__) --------------------
_OFFSETS = (0.0, 1.0, 1.25, 1.5, 1.75, 2.0, 2.25, 2.5, 2.75, 3.0,
            3.5, 4.0, 4.5, 5.0, 5.5, 6.0, 7.0, 8.0, 9.0, 10.0)
NUM_GAUSSIANS = len(_OFFSETS)                       # 20
COEFF = -0.5 / (_OFFSETS[1] - _OFFSETS[0]) ** 2     # = -0.5 (pure Python scalar)

# (20, 1) offset column, passed to the kernel as an input (NOT captured).
_OFFSETS_COL = np.asarray(_OFFSETS, dtype=np.float32).reshape(NUM_GAUSSIANS, 1)


def _gaussian_smearing_kernel(offset_ref, dist_ref, out_ref):
    # offset_ref: (NUM_GAUSSIANS, 1) f32 -- Gaussian centers (column).
    # dist_ref:   (1, TILE_N) f32       -- distances on the lane axis.
    # out_ref:    (NUM_GAUSSIANS, TILE_N)
    d = dist_ref[...]                           # (1, TILE_N)
    diff = d - offset_ref[...]                  # (20, TILE_N) lane-dense bcast
    out_ref[...] = jnp.exp(COEFF * (diff * diff)).astype(out_ref.dtype)


def gaussian_smearing(dist: jax.Array, *, tile_n: int = 32768,
                      out_dtype=jnp.float32,
                      transpose_to_torch_layout: bool = True) -> jax.Array:
    """Pallas implementation of GaussianSmearing.forward.

    Accepts `dist` of any shape.  With `transpose_to_torch_layout=True`
    (default) returns (dist.size, NUM_GAUSSIANS) to match the PyTorch module;
    with False returns the lane-dense (NUM_GAUSSIANS, dist.size) form and
    skips the extra HBM transpose pass.
    """
    dist_flat = jnp.reshape(dist, (-1,)).astype(jnp.float32)
    n = dist_flat.shape[0]

    if n == 0:  # guard: empty input -> no kernel launch
        empty = jnp.zeros((NUM_GAUSSIANS, 0), out_dtype)
        return empty.T if transpose_to_torch_layout else empty

    # Clamp the tile to the 128-aligned problem size so small inputs do not
    # allocate oversized VMEM buffers; last block dim stays a multiple of 128.
    tile = min(tile_n, ((n + 127) // 128) * 128)
    grid = (pl.cdiv(n, tile),)              # ragged last block handled by Pallas

    dist_row = dist_flat.reshape(1, n)      # free reshape of a contiguous array
    offsets_col = jnp.asarray(_OFFSETS_COL) # (20, 1) kernel input

    out_t = pl.pallas_call(
        _gaussian_smearing_kernel,
        out_shape=jax.ShapeDtypeStruct((NUM_GAUSSIANS, n), out_dtype),
        grid_spec=pl.GridSpec(
            grid=grid,
            in_specs=[
                # Offsets: full-array block, identical for every grid step.
                pl.BlockSpec((NUM_GAUSSIANS, 1), lambda i: (0, 0)),
                # Distances: lane-dense (1, tile) row per grid step.
                pl.BlockSpec((1, tile), lambda i: (0, i)),
            ],
            out_specs=pl.BlockSpec((NUM_GAUSSIANS, tile), lambda i: (0, i)),
        ),
        compiler_params=pltpu.CompilerParams(
            dimension_semantics=("parallel",),
        ),
    )(offsets_col, dist_row)

    if transpose_to_torch_layout:
        return out_t.T                      # (n, 20): matches PyTorch layout
    return out_t                            # (20, n): lane-dense fast path


def _reference(dist: jax.Array) -> jax.Array:
    d = (jnp.reshape(dist, (-1, 1)).astype(jnp.float32)
         - jnp.asarray(_OFFSETS, jnp.float32).reshape(1, -1))
    return jnp.exp(COEFF * d * d)


if __name__ == "__main__":
    key = jax.random.PRNGKey(0)

    # Small example: a batch of pairwise distances, e.g. 8 x 16 edges (=128).
    dist = jax.random.uniform(key, (8, 16), dtype=jnp.float32,
                              minval=0.0, maxval=10.0)
    ref = _reference(dist)

    # Default path: PyTorch-compatible (N, 20) f32 output.
    out = jax.block_until_ready(gaussian_smearing(dist))
    assert out.shape == (dist.size, NUM_GAUSSIANS), out.shape
    assert jnp.allclose(out, ref, atol=1e-5, rtol=1e-5), "mismatch vs reference"

    # Lane-dense (20, N) fast path (no final transpose pass).
    out_t = jax.block_until_ready(
        gaussian_smearing(dist, transpose_to_torch_layout=False))
    assert out_t.shape == (NUM_GAUSSIANS, dist.size), out_t.shape
    assert jnp.allclose(out_t, ref.T, atol=1e-5, rtol=1e-5), "mismatch (lane-dense)"

    # Ragged case: N not a multiple of 128 (exercises masked writeback).
    key2 = jax.random.PRNGKey(0)
    dist_ragged = jax.random.uniform(key2, (7, 9), dtype=jnp.float32,
                                     minval=0.0, maxval=10.0)
    out_r = jax.block_until_ready(gaussian_smearing(dist_ragged))
    assert out_r.shape == (dist_ragged.size, NUM_GAUSSIANS), out_r.shape
    assert jnp.allclose(out_r, _reference(dist_ragged), atol=1e-5, rtol=1e-5), \
        "mismatch (ragged)"

    print("KERNEL_OK")
</pallas_src>

<mosaic_0001>
module attributes {stable_mosaic.version = 11 : i64} {
  func.func @_gaussian_smearing_kernel(%arg0: i32, %arg1: memref<20x1xf32, #tpu.memory_space<vmem>>, %arg2: memref<1x128xf32, #tpu.memory_space<vmem>>, %arg3: memref<20x128xf32, #tpu.memory_space<vmem>>) attributes {dimension_semantics = [#tpu.dimension_semantics<parallel>], iteration_bounds = array<i64: 1>, scalar_prefetch = 0 : i64, scratch_operands = 0 : i64, tpu.core_type = #tpu.core_type<tc>, window_params = [{pipeline_mode = #tpu.pipeline_mode<synchronous>, transform_indices = @transform_0, window_bounds = array<i64: 20, 1>}, {transform_indices = @transform_1, window_bounds = array<i64: 1, 128>}, {transform_indices = @transform_2, window_bounds = array<i64: 20, 128>}]} {
    %c0 = arith.constant 0 : index
    %c0_0 = arith.constant 0 : index
    %0 = vector.load %arg2[%c0, %c0_0] : memref<1x128xf32, #tpu.memory_space<vmem>>, vector<1x128xf32>
    %c0_1 = arith.constant 0 : index
    %c0_2 = arith.constant 0 : index
    %1 = vector.load %arg1[%c0_1, %c0_2] : memref<20x1xf32, #tpu.memory_space<vmem>>, vector<20x1xf32>
    %2 = vector.broadcast %0 : vector<1x128xf32> to vector<20x128xf32>
    %3 = vector.broadcast %1 : vector<20x1xf32> to vector<20x128xf32>
    %4 = arith.subf %2, %3 : vector<20x128xf32>
    %5 = arith.mulf %4, %4 : vector<20x128xf32>
    %cst = arith.constant -5.000000e-01 : f32
    %6 = vector.broadcast %cst : f32 to vector<20x128xf32>
    %7 = arith.mulf %6, %5 : vector<20x128xf32>
    %8 = math.exp %7 : vector<20x128xf32>
    %c0_3 = arith.constant 0 : index
    %c0_4 = arith.constant 0 : index
    %9 = vector.load %arg3[%c0_3, %c0_4] : memref<20x128xf32, #tpu.memory_space<vmem>>, vector<20x128xf32>
    tpu.vector_store %arg3[%c0_3, %c0_4], %8 {strides = array<i32>} : memref<20x128xf32, #tpu.memory_space<vmem>>, vector<20x128xf32>,
    return
  }
  func.func @transform_0(%arg0: i32) -> (i32, i32) {
    %c0_i32 = arith.constant 0 : i32
    %c0_i32_0 = arith.constant 0 : i32
    %c0_i32_1 = arith.constant 0 : i32
    return %c0_i32, %c0_i32_0 : i32, i32
  }
  func.func @transform_1(%arg0: i32) -> (i32, i32) {
    %c0_i32 = arith.constant 0 : i32
    %c0_i32_0 = arith.constant 0 : i32
    return %c0_i32, %arg0 : i32, i32
  }
  func.func @transform_2(%arg0: i32) -> (i32, i32) {
    %c0_i32 = arith.constant 0 : i32
    %c0_i32_0 = arith.constant 0 : i32
    return %c0_i32, %arg0 : i32, i32
  }
}

</mosaic_0001>

<bundles_post_ra>
// kernel: tpu_custom_call.1
= control target key start
LH: loop header
LB: loop body
LE: loop exit
PB: predicated region body
PF: predicated region fallthrough
CT: control target
= control target key end

     0   :  { %v106_v2 = vmov 0   ;;  %s140_s0 = inlined_call_operand.vmem [shape: f32[20,1], index: 0, kind: input, shape index: {}]   ;;  %s141_s1 = inlined_call_operand.vmem [shape: f32[1,128], index: 1, kind: input, shape index: {}]   ;;  %s142_s2 = inlined_call_operand.hbm [shape: f32[20,128], index: 2, kind: output, shape index: {}]  }
   0x1   :  { %v13_v0 = vld [vmem:[%s140_s0] sm:$0xff]  ;;  %v15_v1 = vld [vmem:[%s140_s0 + $0x10] sm:$0xf]  ;;  %76 = vset.pattern.permute.xlu0 %v106_v2  ;;  %77 = vset.pattern.permute.xlu1 %v106_v2 }
   0x2   :  { %7 = vsyncpa [#allocation3], 0  ;;  %24 = vperm.xlu0 %76, %v13_v0   ;;  %34 = vperm.xlu1 %77, %v15_v1   ;;  %v14_v3 = vld [vmem:[%s140_s0 + $0x8] sm:$0xff]  ;;  %v71_v4 = vld [vmem:[%s141_s1] ss:$0 sm:$0xff]  ;;  %s107_s0 = smov [#allocation2]  }
   0x3   :  { %s60_s1 = sshll.u32 %s107_s0, 4  ;;  %s61_s1 = int_to_ptr.vmem [resolvable:$true] %s60_s1 }
   0x4   :  { %s84_s17 = scalar_lea.vmem %s61_s1, 384  ;;  %p89_p1 = scmp.lt.s32.totalorder %s61_s1, %s61_s1 }
   0x5   :  { %p85_p0 = scmp.ne.s32.totalorder %s61_s1, %s84_s17  ;;  %p90_p2 = scmp.lt.s32.totalorder %s84_s17, %s84_s17 }
   0x6   :  { %29 = vperm.xlu0 %76, %v14_v3  }
   0x7   :  { %p91_p3 = por %p90_p2, %p89_p1 }
   0x9   :  { %p92_p4 = pnand %p91_p3, %p85_p0 }
  0x7d   :  { %v25_v5 = vpop.permute.xlu0 %24  ;;  %v35_v6 = vpop.permute.xlu1 %34 }
  0x7e   :  { %v37_v7 = vsub.f32 %v71_v4, %v25_v5  ;;  %v39_v8 = vsub.f32 %v71_v4, %v35_v6 }
  0x80   :  { %v40_v9 = vmul.f32 %v37_v7, %v37_v7  ;;  %v42_v10 = vmul.f32 %v39_v8, %v39_v8 }
  0x81   :  { %v30_v11 = vpop.permute.xlu0 %29 }
  0x82   :  { %v43_v12 = vmul.f32 -0.5, %v40_v9  ;;  %v45_v13 = vmul.f32 -0.5, %v42_v10  ;;  %v38_v14 = vsub.f32 %v71_v4, %v30_v11 }
  0x84   :  { %v46_v15 = vmul.f32 1.442695, %v43_v12  ;;  %v50_v16 = vmul.f32 1.442695, %v45_v13  ;;  %v41_v17 = vmul.f32 %v38_v14, %v38_v14 }
  0x86   :  { %78 = vpow2.f32 %v46_v15  ;;  %v44_v18 = vmul.f32 -0.5, %v41_v17 }
  0x87   :  { %80 = vpow2.f32 %v50_v16 }
  0x88   :  { %v48_v19 = vmul.f32 1.442695, %v44_v18 }
  0x8a   :  { %82 = vpow2.f32 %v48_v19 }
  0x93   :  { %v79_v20 = vpop.eup %78 }
  0x94   :  { %v81_v21 = vpop.eup %80  ;;  %52 = vst [vmem:[#allocation2] sm:$0xff] %v79_v20 }
  0x95   :  { %54 = vst [vmem:[#allocation2 + $0x10] sm:$0xf] %v81_v21 }
  0x97   :  { %v83_v22 = vpop.eup %82 }
  0x98   :  { %53 = vst [vmem:[#allocation2 + $0x8] sm:$0xff] %v83_v22 }
  0x99   :  { %95 = shalt.err (!%p92_p4)
}
  0x9a   :  { %s108_s18 = smov 128   ;;  %s109_s19 = smov 8  }
  0x9b   :  { %66 = dma.vmem_to_hbm [thread:$0]  %s61_s1, 384, %s142_s2, [#allocation3], %s108_s18, %s108_s18, %s109_s19  }
  0x9c   :  { %104 = dma.done.wait [#allocation3], 384  }
  0x9d   :  { %105 = vsyncadd [#allocation3], 4294966912 }
  0x9e   :  { %70 = vsyncpa [#allocation3], 1 }

</bundles_post_ra>
